<compile_context>
chip_gen: v5e
topology: v5e:2x2
jax: 0.10.0
libtpu: 0.0.40
codegen_flags: <defaults>
</compile_context>

<pallas_src>
import numpy as np
import jax
import jax.numpy as jnp
from jax import lax
from jax.experimental import pallas as pl
from jax.experimental.pallas import tpu as pltpu


def _balanced_softmax_kernel(logits_ref, log_prior_ref, labels_ref, out_ref):
    # Upcast in-kernel so bf16 inputs can be streamed at half the HBM bytes.
    adj = logits_ref[...].astype(jnp.float32) + log_prior_ref[...].astype(jnp.float32)  # (T, C)

    # Numerically-stable logsumexp over classes (full C held in one block).
    m = jnp.max(adj, axis=-1, keepdims=True)                                  # (T, 1)
    lse = m + jnp.log(jnp.sum(jnp.exp(adj - m), axis=-1, keepdims=True))      # (T, 1)

    # Gather the label logit via select+reduce (no one-hot float temp / extra vmul).
    col = lax.broadcasted_iota(jnp.int32, adj.shape, 1)                       # (T, C)
    label_logit = jnp.sum(jnp.where(col == labels_ref[...], adj, 0.0),
                          axis=-1, keepdims=True)                             # (T, 1)

    # Per-sample NLL partials; the mean over the true batch is finished outside.
    out_ref[...] = lse - label_logit                                          # (T, 1)


def _choose_tile_n(n, c, itemsize):
    """Pick a batch tile sized to the chip's VMEM (v7x 64 MiB vs v5e/v6e 128 MiB)."""
    try:
        vmem_cap = pltpu.get_tpu_info().vmem_capacity_bytes
    except Exception:
        vmem_cap = 64 * 1024 * 1024          # v7x-safe fallback
    budget = vmem_cap // 4                   # double-buffered logits tile gets ~1/4 of VMEM
    cap = max(8, budget // (2 * c * itemsize))
    tile = min(n, cap, 1024)                 # >1024 rows: per-step overhead already amortized
    tile = max(8, (tile // 8) * 8)           # sublane multiple
    return min(tile, n)


def balanced_softmax_loss(logits, labels, log_prior, *, tile_n=None):
    """logits: (N, C) f32/bf16, labels: (N,) int, log_prior: (1, C) f32 -> scalar f32."""
    n, c = logits.shape
    itemsize = jnp.dtype(logits.dtype).itemsize
    if tile_n is None:
        tile_n = _choose_tile_n(n, c, itemsize)
    tile_n = min(tile_n, n)

    # Pad the batch to a tile multiple (padded rows are sliced off before the mean).
    n_pad = pl.cdiv(n, tile_n) * tile_n
    labels2d = labels.astype(jnp.int32).reshape(n, 1)
    if n_pad != n:
        logits = jnp.pad(logits, ((0, n_pad - n), (0, 0)))
        labels2d = jnp.pad(labels2d, ((0, n_pad - n), (0, 0)))

    # Explicit, right-sized VMEM budget (double-buffered logits tile dominates).
    vmem_need = (2 * tile_n * c * itemsize   # logits tile, double-buffered
                 + 2 * c * 4                 # resident (1, C) log prior
                 + 2 * tile_n * 4            # labels tile
                 + 2 * tile_n * 4)           # per-sample output tile
    vmem_limit = int(min(max(vmem_need + (4 << 20), 16 << 20), 60 << 20))

    per_sample = pl.pallas_call(
        _balanced_softmax_kernel,
        out_shape=jax.ShapeDtypeStruct((n_pad, 1), jnp.float32),
        grid_spec=pltpu.PrefetchScalarGridSpec(
            num_scalar_prefetch=0,
            grid=(n_pad // tile_n,),
            in_specs=[
                pl.BlockSpec((tile_n, c), lambda i: (i, 0)),   # logits tile (pipelined)
                pl.BlockSpec((1, c), lambda i: (0, 0)),        # log prior, resident
                pl.BlockSpec((tile_n, 1), lambda i: (i, 0)),   # labels tile (tiny)
            ],
            out_specs=pl.BlockSpec((tile_n, 1), lambda i: (i, 0)),
        ),
        compiler_params=pltpu.CompilerParams(
            dimension_semantics=("parallel",),                 # independent tiles -> both TCs on v7x
            vmem_limit_bytes=vmem_limit,
        ),
    )(logits, log_prior, labels2d)

    # Finish the mean over the true (unpadded) batch in the wrapper.
    return jnp.sum(per_sample[:n, 0]) / n


def make_log_prior(cls_num_list):
    """Mirrors BalancedSoftmaxLoss.__init__: log of class prior, shape (1, C)."""
    cls_num = jnp.asarray(np.array(cls_num_list), dtype=jnp.float32)
    cls_prior = cls_num / jnp.sum(cls_num)
    return jnp.log(cls_prior)[None, :]                          # (1, C)


if __name__ == "__main__":
    key = jax.random.PRNGKey(0)
    N, C = 512, 256                      # small but big enough to exercise batch tiling

    # deterministic "long-tailed" class counts for the prior
    cls_num_list = [1000.0 / (i + 1) for i in range(C)]
    log_prior = make_log_prior(cls_num_list)

    k1, k2 = jax.random.split(key)
    logits = jax.random.normal(k1, (N, C), dtype=jnp.float32)
    labels = jax.random.randint(k2, (N,), 0, C, dtype=jnp.int32)

    # f32 path, forced tile_n=128 so the grid/pipelining path (grid=(4,)) is exercised
    loss = balanced_softmax_loss(logits, labels, log_prior, tile_n=128)
    loss = jax.block_until_ready(loss)

    # reference in plain JAX (same math as F.cross_entropy, reduction='mean')
    adj = logits + log_prior
    ref = jnp.mean(jax.nn.logsumexp(adj, axis=-1) - adj[jnp.arange(N), labels])
    assert jnp.allclose(loss, ref, rtol=1e-5, atol=1e-5), (loss, ref)

    # bf16 pass-through path (half the HBM bytes; upcast happens inside the kernel)
    loss_bf16 = balanced_softmax_loss(logits.astype(jnp.bfloat16), labels, log_prior)
    loss_bf16 = jax.block_until_ready(loss_bf16)
    assert jnp.allclose(loss_bf16, ref, rtol=5e-2, atol=5e-2), (loss_bf16, ref)

    print("KERNEL_OK")
</pallas_src>

<mosaic_0001>
module attributes {stable_mosaic.version = 11 : i64} {
  func.func @_balanced_softmax_kernel(%arg0: i32, %arg1: memref<128x256xf32, #tpu.memory_space<vmem>>, %arg2: memref<1x256xf32, #tpu.memory_space<vmem>>, %arg3: memref<128x1xi32, #tpu.memory_space<vmem>>, %arg4: memref<128x1xf32, #tpu.memory_space<vmem>>) attributes {dimension_semantics = [#tpu.dimension_semantics<parallel>], iteration_bounds = array<i64: 4>, scalar_prefetch = 0 : i64, scratch_operands = 0 : i64, tpu.core_type = #tpu.core_type<tc>, window_params = [{transform_indices = @transform_0, window_bounds = array<i64: 128, 256>}, {pipeline_mode = #tpu.pipeline_mode<synchronous>, transform_indices = @transform_1, window_bounds = array<i64: 1, 256>}, {transform_indices = @transform_2, window_bounds = array<i64: 128, 1>}, {transform_indices = @transform_3, window_bounds = array<i64: 128, 1>}]} {
    %c0 = arith.constant 0 : index
    %c0_0 = arith.constant 0 : index
    %0 = vector.load %arg1[%c0, %c0_0] : memref<128x256xf32, #tpu.memory_space<vmem>>, vector<128x256xf32>
    %c0_1 = arith.constant 0 : index
    %c0_2 = arith.constant 0 : index
    %1 = vector.load %arg2[%c0_1, %c0_2] : memref<1x256xf32, #tpu.memory_space<vmem>>, vector<1x256xf32>
    %2 = vector.broadcast %1 : vector<1x256xf32> to vector<128x256xf32>
    %3 = arith.addf %0, %2 : vector<128x256xf32>
    %cst = arith.constant dense<0xFF800000> : vector<128xf32>
    %4 = vector.multi_reduction <maximumf>, %3, %cst [1] : vector<128x256xf32> to vector<128xf32>
    %5 = vector.shape_cast %4 : vector<128xf32> to vector<128x1xf32>
    %6 = vector.broadcast %5 : vector<128x1xf32> to vector<128x256xf32>
    %7 = arith.subf %3, %6 : vector<128x256xf32>
    %8 = math.exp %7 : vector<128x256xf32>
    %cst_3 = arith.constant dense<0.000000e+00> : vector<128xf32>
    %9 = vector.multi_reduction <add>, %8, %cst_3 [1] : vector<128x256xf32> to vector<128xf32>
    %10 = vector.shape_cast %9 : vector<128xf32> to vector<128x1xf32>
    %11 = math.log %10 : vector<128x1xf32>
    %12 = arith.addf %5, %11 : vector<128x1xf32>
    %13 = tpu.iota {dimensions = array<i32: 1>} : vector<128x256xi32>
    %c0_4 = arith.constant 0 : index
    %c0_5 = arith.constant 0 : index
    %14 = vector.load %arg3[%c0_4, %c0_5] : memref<128x1xi32, #tpu.memory_space<vmem>>, vector<128x1xi32>
    %15 = vector.broadcast %14 : vector<128x1xi32> to vector<128x256xi32>
    %16 = arith.cmpi eq, %13, %15 : vector<128x256xi32>
    %cst_6 = arith.constant 0.000000e+00 : f32
    %17 = vector.broadcast %cst_6 : f32 to vector<128x256xf32>
    %18 = arith.select %16, %3, %17 : vector<128x256xi1>, vector<128x256xf32>
    %cst_7 = arith.constant dense<0.000000e+00> : vector<128xf32>
    %19 = vector.multi_reduction <add>, %18, %cst_7 [1] : vector<128x256xf32> to vector<128xf32>
    %20 = vector.shape_cast %19 : vector<128xf32> to vector<128x1xf32>
    %21 = arith.subf %12, %20 : vector<128x1xf32>
    %c0_8 = arith.constant 0 : index
    %c0_9 = arith.constant 0 : index
    %22 = vector.load %arg4[%c0_8, %c0_9] : memref<128x1xf32, #tpu.memory_space<vmem>>, vector<128x1xf32>
    tpu.vector_store %arg4[%c0_8, %c0_9], %21 {strides = array<i32>} : memref<128x1xf32, #tpu.memory_space<vmem>>, vector<128x1xf32>,
    return
  }
  func.func @transform_0(%arg0: i32) -> (i32, i32) {
    %c0_i32 = arith.constant 0 : i32
    %c0_i32_0 = arith.constant 0 : i32
    return %arg0, %c0_i32 : i32, i32
  }
  func.func @transform_1(%arg0: i32) -> (i32, i32) {
    %c0_i32 = arith.constant 0 : i32
    %c0_i32_0 = arith.constant 0 : i32
    %c0_i32_1 = arith.constant 0 : i32
    return %c0_i32, %c0_i32_0 : i32, i32
  }
  func.func @transform_2(%arg0: i32) -> (i32, i32) {
    %c0_i32 = arith.constant 0 : i32
    %c0_i32_0 = arith.constant 0 : i32
    return %arg0, %c0_i32 : i32, i32
  }
  func.func @transform_3(%arg0: i32) -> (i32, i32) {
    %c0_i32 = arith.constant 0 : i32
    %c0_i32_0 = arith.constant 0 : i32
    return %arg0, %c0_i32 : i32, i32
  }
}

</mosaic_0001>

<bundles_post_ra>
// kernel: tpu_custom_call.1
= control target key start
LH: loop header
LB: loop body
LE: loop exit
PB: predicated region body
PF: predicated region fallthrough
CT: control target
= control target key end

     0   :  { %8 = vsyncpa [#allocation3], 0  ;;  %s1607_s0 = inlined_call_operand.hbm [shape: f32[512,256], index: 0, kind: input, shape index: {}]   ;;  %s1608_s1 = inlined_call_operand.vmem [shape: f32[1,256], index: 1, kind: input, shape index: {}]   ;;  %s1609_s2 = inlined_call_operand.vmem [shape: s32[512,1], index: 2, kind: input, shape index: {}]   ;;  %s1610_s3 = inlined_call_operand.vmem [shape: f32[512,1], index: 3, kind: output, shape index: {}]  }
   0x1   :  { %10 = vsyncpa [#allocation3 + $0x1], 0  ;;  %s1067_s12 = smov 0   ;;  %s1069_s13 = smov 0  }
   0x2   :  { %s1071_s14 = smov 0   ;;  %s1073_s15 = smov 0  }
   0x3 LB: > { %s819_s16 = sadd.s32 4294967295, %s1042_s15   ;;  %s1087_s17 = sadd.s32 1, %s1042_s15   ;;  %s1042_s15 = sphi %s1073_s15, %s1632_s15   ;;  %s1038_s14 = sphi %s1071_s14, %s1631_s14   ;;  %s1034_s13 = sphi %s1069_s13, %s1630_s13   ;;  %s1030_s12 = sphi %s1067_s12, %s1629_s12  }
   0x4   : > { %s20_s18 = ssub.s32 %s1042_s15, %s1087_s17  ;;  %s23_s19 = sadd.s32 1, %s1038_s14 }
   0x5   : > { %p21_p0 = scmp.eq.s32.totalorder %s20_s18, 0  ;;  %p30_p1 = scmp.ne.s32.totalorder %s1038_s14, %s1034_s13 }
   0x6   : > { %p31_p2 = scmp.eq.s32.totalorder %s1042_s15, 0  ;;  %p36_p3 = scmp.ne.s32.totalorder %s1034_s13, %s1030_s12 }
   0x7   : > { %s1097_s20 = scalar_select %p21_p0, %s1038_s14, %s23_s19  }
   0x8   : > { %p1099_p4 = por %p31_p2, %p30_p1  ;;  %p37_p5 = scmp.eq.s32.totalorder %s819_s16, 0 }
   0x9   : > { %p843_p6 = scmp.lt.s32.totalorder %s1042_s15, 4  ;;  %s136_s23 = sand.u32 1, %s1038_s14  }
   0xa   : > { %p1106_p7 = por %p37_p5, %p36_p3  ;;  %s823_s24 = sshll.u32 %s136_s23, 8 }
   0xb   : > { %s836_s25 = sshll.u32 %s1042_s15, 8  ;;  %s140_s29 = scalar_lea.vmem [#allocation2], %s823_s24 }
   0xc   : > { %s146_s28 = scalar_lea.hbm %s1607_s0, %s836_s25  ;;  %s149_s30 = sshll.u32 %s140_s29, 4  ;;  %s150_s30 = int_to_ptr.vmem [resolvable:$true] %s149_s30 }
   0xd   : > { %s147_s4 = sshll.u32 %s146_s28, 4  ;;  %p1117_p8 = pnand %p843_p6, %p1099_p4  ;;  %s148_s4 = int_to_ptr.hbm [resolvable:$true] %s147_s4 }
   0xe   : > { %p827_p9 = scmp.ge.s32.totalorder %s1042_s15, 1  ;;  %s137_s6 = scalar_lea.sflag [#allocation3], %s136_s23 }
   0xf   : > { %s978_s7 = sshra.s32 %s148_s4, 4  ;;  %p982_p11 = pneg %p1117_p8  ;;  %s979_s7 = int_to_ptr.hbm [resolvable:$true] %s978_s7 }
  0x10   : > { %s980_s8 = scalar_lea.hbm %s979_s7, 256  ;;  %s985_s11 = scalar_lea.hbm %s1607_s0, 1024 }
  0x11   : > { %p981_p10 = scmp.ne.s32.totalorder %s979_s7, %s980_s8  ;;  %p986_p0 = scmp.lt.s32.totalorder %s979_s7, %s1607_s0 }
  0x12   : > { %p987_p1 = scmp.lt.s32.totalorder %s985_s11, %s980_s8 }
  0x13   : > { %p983_p12 = pnand %p982_p11, %p981_p10 }
  0x14   : > { %p988_p2 = por %p987_p1, %p986_p0 }
  0x15   : > { %p984_p13 = pneg %p983_p12 }
  0x17   : > { %p989_p3 = pnand %p988_p2, %p984_p13 }
  0x19   : > { %992 = shalt.err (!%p989_p3)
}
  0x1a   : > { %s1044_s19 = smov 256   ;;  %s1045_s21 = smov 16  }
  0x1b   : > { %842 = dma.hbm_to_vmem [thread:$0]  (!%p1117_p8), %s148_s4, 4096, %s150_s30, %s137_s6, %s1044_s19, %s1044_s19, %s1045_s21  }
  0x1c   : > { %p166_p4 = scmp.lt.s32.totalorder %s1042_s15, 5 }
  0x1e   : > { %p167_p5 = pnand %p827_p9, %p166_p4 }
  0x20   : > { %170 = sbr.rel (%p167_p5) target bundleno = 469 (0x1d5), region = 32 }
  0x25   : > { %s172_s23 = sand.u32 1, %s1034_s13  }
  0x26   : > { %s828_s24 = sshll.u32 %s172_s23, 8  ;;  %s173_s25 = scalar_lea.sflag [#allocation3], %s172_s23 }
  0x27   : > { %s1136_s26 = scalar_lea.vmem [#allocation2], %s828_s24 }
  0x28   : > { %1025 = dma.done.wait (%p1106_p7), %s173_s25, 4096  }
  0x29   : > { %1027 = vsyncadd (%p1106_p7), %s173_s25, 4294963200  ;;  %v226_v0 = vld [vmem:[%s1136_s26 + $0x40] sm:$0xff]  ;;  %v227_v1 = vld [vmem:[%s1136_s26 + $0x48] sm:$0xff]  ;;  %v1046_v45 = vmov 0   ;;  %s829_s22 = sshll.u32 %s819_s16, 4 }
  0x2a   : > { %v250_v2 = vld [vmem:[%s1608_s1] sm:$0x3]  ;;  %v223_v6 = vld [vmem:[%s1136_s26 + $0x28] sm:$0xff]  ;;  %v228_v13 = vld [vmem:[%s1136_s26 + $0x50] sm:$0xff]  ;;  %879 = vset.pattern.permute.xlu2 %v1046_v45  ;;  %881 = vset.pattern.permute.xlu1 %v1046_v45  ;;  %p207_p6 = scmp.lt.s32.totalorder %s829_s22, 63 }
  0x2b   : > { %v1147_v3 = vperm.slane %v250_v2, 0  ;;  %v1149_v4 = vperm.slane %v250_v2, 1  ;;  %v222_v5 = vld [vmem:[%s1136_s26 + $0x20] sm:$0xff]  ;;  %v219_v8 = vld [vmem:[%s1136_s26 + $0x8] sm:$0xff]  ;;  %v229_v16 = vld [vmem:[%s1136_s26 + $0x58] sm:$0xff]  ;;  %880 = vset.pattern.permute.xlu0 %v1046_v45 }
  0x2c   : > { %v218_v7 = vld [vmem:[%s1136_s26] sm:$0xff]  ;;  %v224_v17 = vld [vmem:[%s1136_s26 + $0x30] sm:$0xff]  ;;  %v225_v18 = vld [vmem:[%s1136_s26 + $0x38] sm:$0xff]  ;;  %s1634_s22 = smov (!%p207_p6, %s829_s22), 63 }
  0x2d   : > { %v1156_v9 = vadd.f32 %v1147_v3, %v226_v0  ;;  %v1159_v10 = vadd.f32 %v1149_v4, %v227_v1  ;;  %v1162_v11 = vadd.f32 %v1147_v3, %v222_v5  ;;  %v1165_v12 = vadd.f32 %v1149_v4, %v223_v6  ;;  %v220_v21 = vld [vmem:[%s1136_s26 + $0x10] sm:$0xff]  ;;  %v221_v22 = vld [vmem:[%s1136_s26 + $0x18] sm:$0xff]  ;;  %v234_v32 = vld [vmem:[%s1136_s26 + $0x80] sm:$0xff]  ;;  %s830_s29 = sshll.u32 %s1634_s22, 3 }
  0x2e   : > { %v1169_v14 = vadd.f32 %v1147_v3, %v218_v7  ;;  %v1172_v15 = vadd.f32 %v1149_v4, %v219_v8  ;;  %v1186_v24 = vadd.f32 %v1147_v3, %v228_v13  ;;  %v1189_v25 = vadd.f32 %v1149_v4, %v229_v16  ;;  %v235_v34 = vld [vmem:[%s1136_s26 + $0x88] sm:$0xff]  ;;  %v232_v35 = vld [vmem:[%s1136_s26 + $0x70] sm:$0xff]  ;;  %v233_v36 = vld [vmem:[%s1136_s26 + $0x78] sm:$0xff]  ;;  %s1319_s5 = scalar_lea.vmem %s1609_s2, %s830_s29  ;;  %s1528_s6 = scalar_lea.vmem %s1610_s3, %s830_s29 }
  0x2f   : > { %v300_v19 = vmax.f32 %v1156_v9, %v1159_v10  ;;  %v294_v20 = vmax.f32 %v1162_v11, %v1165_v12  ;;  %v1192_v26 = vadd.f32 %v1147_v3, %v224_v17  ;;  %v1195_v27 = vadd.f32 %v1149_v4, %v225_v18  ;;  %v230_v37 = vld [vmem:[%s1136_s26 + $0x60] sm:$0xff]  ;;  %v231_v38 = vld [vmem:[%s1136_s26 + $0x68] sm:$0xff]  ;;  %v240_v48 = vld [vmem:[%s1136_s26 + $0xb0] sm:$0xff] }
  0x30   : > { %v288_v23 = vmax.f32 %v1169_v14, %v1172_v15  ;;  %v1198_v28 = vadd.f32 %v1147_v3, %v220_v21  ;;  %v1201_v29 = vadd.f32 %v1149_v4, %v221_v22  ;;  %v303_v30 = vmax.f32 %v1186_v24, %v1189_v25  ;;  %v241_v50 = vld [vmem:[%s1136_s26 + $0xb8] sm:$0xff]  ;;  %v238_v51 = vld [vmem:[%s1136_s26 + $0xa0] sm:$0xff]  ;;  %v239_v52 = vld [vmem:[%s1136_s26 + $0xa8] sm:$0xff] }
  0x31   : > { %301 = vmax.xlane.f32.xlu2 %v300_v19  ;;  %295 = vmax.xlane.f32.xlu1 %v294_v20  ;;  %v297_v31 = vmax.f32 %v1192_v26, %v1195_v27  ;;  %v1216_v39 = vadd.f32 %v1147_v3, %v234_v32  ;;  %v1219_v40 = vadd.f32 %v1149_v4, %v235_v34  ;;  %v236_v53 = vld [vmem:[%s1136_s26 + $0x90] sm:$0xff]  ;;  %v237_v54 = vld [vmem:[%s1136_s26 + $0x98] sm:$0xff]  ;;  %v246_v63 = vld [vmem:[%s1136_s26 + $0xe0] sm:$0xff] }
  0x32   : > { %289 = vmax.xlane.f32.xlu0 %v288_v23  ;;  %v291_v33 = vmax.f32 %v1198_v28, %v1201_v29  ;;  %v1222_v41 = vadd.f32 %v1147_v3, %v232_v35  ;;  %v1225_v42 = vadd.f32 %v1149_v4, %v233_v36  ;;  %v1228_v43 = vadd.f32 %v1147_v3, %v230_v37  ;;  %v247_v1 = vld [vmem:[%s1136_s26 + $0xe8] sm:$0xff]  ;;  %v244_v2 = vld [vmem:[%s1136_s26 + $0xd0] sm:$0xff]  ;;  %v245_v5 = vld [vmem:[%s1136_s26 + $0xd8] sm:$0xff] }
  0x33   : > { %v1231_v44 = vadd.f32 %v1149_v4, %v231_v38  ;;  %v312_v46 = vmax.f32 %v1216_v39, %v1219_v40  ;;  %v1246_v55 = vadd.f32 %v1147_v3, %v240_v48  ;;  %v1249_v56 = vadd.f32 %v1149_v4, %v241_v50  ;;  %v242_v6 = vld [vmem:[%s1136_s26 + $0xc0] sm:$0xff]  ;;  %v243_v7 = vld [vmem:[%s1136_s26 + $0xc8] sm:$0xff]  ;;  %v248_v23 = vld [vmem:[%s1136_s26 + $0xf0] sm:$0xff] }
  0x34   : > { %v309_v47 = vmax.f32 %v1222_v41, %v1225_v42  ;;  %v1252_v57 = vadd.f32 %v1147_v3, %v238_v51  ;;  %v1255_v58 = vadd.f32 %v1149_v4, %v239_v52  ;;  %v1258_v59 = vadd.f32 %v1147_v3, %v236_v53  ;;  %v532_v34 = vld [vmem:[%s1319_s5 + $0x8] sm:$0xff]  ;;  %v534_v35 = vld [vmem:[%s1319_s5 + $0x18] sm:$0xff]  ;;  %v539_v37 = vld [vmem:[%s1319_s5 + $0x40] sm:$0xff] }
  0x35   : > { %v306_v49 = vmax.f32 %v1228_v43, %v1231_v44  ;;  %v1261_v60 = vadd.f32 %v1149_v4, %v237_v54  ;;  %v321_v61 = vmax.f32 %v1246_v55, %v1249_v56  ;;  %v1276_v8 = vadd.f32 %v1147_v3, %v246_v63  ;;  %v536_v36 = vld [vmem:[%s1319_s5 + $0x28] sm:$0xff]  ;;  %v535_v38 = vld [vmem:[%s1319_s5 + $0x20] sm:$0xff]  ;;  %v538_v45 = vld [vmem:[%s1319_s5 + $0x38] sm:$0xff] }
  0x36   : > { %v318_v62 = vmax.f32 %v1252_v57, %v1255_v58  ;;  %v1279_v13 = vadd.f32 %v1149_v4, %v247_v1  ;;  %v1282_v16 = vadd.f32 %v1147_v3, %v244_v2  ;;  %v1285_v17 = vadd.f32 %v1149_v4, %v245_v5  ;;  %v541_v48 = vld [vmem:[%s1319_s5 + $0x50] sm:$0xff]  ;;  %v544_v50 = vld [vmem:[%s1319_s5 + $0x68] sm:$0xff]  ;;  %v543_v51 = vld [vmem:[%s1319_s5 + $0x60] sm:$0xff] }
  0x37   : > { %v315_v0 = vmax.f32 %v1258_v59, %v1261_v60  ;;  %v1288_v18 = vadd.f32 %v1147_v3, %v242_v6  ;;  %v1291_v19 = vadd.f32 %v1149_v4, %v243_v7 }
  0x38   : > { %v330_v20 = vmax.f32 %v1276_v8, %v1279_v13  ;;  %v327_v21 = vmax.f32 %v1282_v16, %v1285_v17 }
  0x39   : > { %304 = vmax.xlane.f32.xlu2 %v303_v30  ;;  %298 = vmax.xlane.f32.xlu1 %v297_v31  ;;  %v324_v22 = vmax.f32 %v1288_v18, %v1291_v19  ;;  %v249_v30 = vld [vmem:[%s1136_s26 + $0xf8] sm:$0xff]  ;;  %v1302_v31 = vadd.f32 %v1147_v3, %v248_v23  ;;  %v531_v3 = vld [vmem:[%s1319_s5] sm:$0xff] }
  0x3a   : > { %292 = vmax.xlane.f32.xlu0 %v291_v33  ;;  %v1305_v32 = vadd.f32 %v1149_v4, %v249_v30  ;;  %v533_v4 = vld [vmem:[%s1319_s5 + $0x10] sm:$0xff] }
  0x3c   : > { %v333_v33 = vmax.f32 %v1302_v31, %v1305_v32 }
  0x41   : > { %313 = vmax.xlane.f32.xlu2 %v312_v46  ;;  %310 = vmax.xlane.f32.xlu1 %v309_v47  ;;  %v542_v46 = vld [vmem:[%s1319_s5 + $0x58] sm:$0xff]  ;;  %v537_v47 = vld [vmem:[%s1319_s5 + $0x30] sm:$0xff] }
  0x42   : > { %307 = vmax.xlane.f32.xlu0 %v306_v49  ;;  %v540_v49 = vld [vmem:[%s1319_s5 + $0x48] sm:$0xff] }
  0x49   : > { %322 = vmax.xlane.f32.xlu2 %v321_v61  ;;  %319 = vmax.xlane.f32.xlu1 %v318_v62 }
  0x4a   : > { %316 = vmax.xlane.f32.xlu0 %v315_v0 }
  0x51   : > { %331 = vmax.xlane.f32.xlu2 %v330_v20  ;;  %328 = vmax.xlane.f32.xlu1 %v327_v21 }
  0x52   : > { %325 = vmax.xlane.f32.xlu0 %v324_v22 }
  0x5a   : > { %334 = vmax.xlane.f32.xlu0 %v333_v33 }
  0x69   : > { %548 = vperm.xlu2 %879, %v531_v3  }
  0x6a   : > { %554 = vperm.xlu1 %881, %v533_v4  }
  0x6e   : > { %551 = vperm.xlu0 %880, %v532_v34  }
  0x71   : > { %557 = vperm.xlu2 %879, %v534_v35  }
  0x72   : > { %563 = vperm.xlu1 %881, %v536_v36  }
  0x76   : > { %572 = vperm.xlu0 %880, %v539_v37  }
  0x79   : > { %560 = vperm.xlu2 %879, %v535_v38  }
  0x7a   : > { %569 = vperm.xlu1 %881, %v538_v45  }
  0x7e   : > { %581 = vperm.xlu0 %880, %v542_v46  }
  0x81   : > { %566 = vperm.xlu2 %879, %v537_v47  }
  0x82   : > { %578 = vperm.xlu1 %881, %v541_v48  }
  0x89   : > { %575 = vperm.xlu2 %879, %v540_v49  }
  0x8a   : > { %587 = vperm.xlu1 %881, %v544_v50  }
  0x91   : > { %584 = vperm.xlu2 %879, %v543_v51  }
  0xa4   : > { %v1335_v52 = vpop.xlane.xlu2 %301  ;;  %v1337_v53 = vpop.xlane.xlu1 %295 }
  0xa5   : > { %1619 = vst [vmem:[#allocation5_spill] sm:$0xff] %v1335_v52  ;;  %v340_v54 = vsub.f32 %v1162_v11, %v1337_v53  ;;  %v341_v61 = vsub.f32 %v1165_v12, %v1337_v53  ;;  %v1343_v62 = vpop.xlane.xlu0 %289  ;;  %v344_v34 = vsub.f32 %v1156_v9, %v1335_v52  ;;  %v345_v37 = vsub.f32 %v1159_v10, %v1335_v52 }
  0xa6   : > { %v336_v63 = vsub.f32 %v1169_v14, %v1343_v62  ;;  %v337_v0 = vsub.f32 %v1172_v15, %v1343_v62 }
  0xa7   : > { %v376_v1 = vmul.f32 1.442695, %v340_v54  ;;  %v378_v2 = vmul.f32 1.442695, %v341_v61  ;;  %v384_v51 = vmul.f32 1.442695, %v344_v34 }
  0xa8   : > { %v368_v5 = vmul.f32 1.442695, %v336_v63  ;;  %v370_v6 = vmul.f32 1.442695, %v337_v0  ;;  %v386_v63 = vmul.f32 1.442695, %v345_v37 }
  0xa9   : > { %882 = vpow2.f32 %v376_v1 }
  0xaa   : > { %884 = vpow2.f32 %v378_v2 }
  0xab   : > { %886 = vpow2.f32 %v368_v5 }
  0xac   : > { %v1349_v7 = vpop.xlane.xlu2 %304  ;;  %v1351_v20 = vpop.xlane.xlu1 %298  ;;  %888 = vpow2.f32 %v370_v6 }
  0xad   : > { %v346_v21 = vsub.f32 %v1186_v24, %v1349_v7  ;;  %v347_v22 = vsub.f32 %v1189_v25, %v1349_v7  ;;  %v1357_v23 = vpop.xlane.xlu0 %292  ;;  %v342_v30 = vsub.f32 %v1192_v26, %v1351_v20  ;;  %v343_v4 = vsub.f32 %v1195_v27, %v1351_v20 }
  0xae   : > { %v338_v33 = vsub.f32 %v1198_v28, %v1357_v23  ;;  %v339_v3 = vsub.f32 %v1201_v29, %v1357_v23 }
  0xaf   : > { %v388_v35 = vmul.f32 1.442695, %v346_v21  ;;  %v390_v36 = vmul.f32 1.442695, %v347_v22  ;;  %v883_v46 = vpop.eup %882  ;;  %v380_v47 = vmul.f32 1.442695, %v342_v30 }
  0xb0   : > { %v372_v38 = vmul.f32 1.442695, %v338_v33  ;;  %v374_v45 = vmul.f32 1.442695, %v339_v3  ;;  %v885_v48 = vpop.eup %884  ;;  %v382_v49 = vmul.f32 1.442695, %v343_v4 }
  0xb1   : > { %890 = vpow2.f32 %v388_v35  ;;  %v887_v50 = vpop.eup %886  ;;  %v438_v54 = vadd.f32 %v885_v48, %v883_v46 }
  0xb2   : > { %892 = vpow2.f32 %v390_v36  ;;  %v889_v61 = vpop.eup %888 }
  0xb3   : > { %894 = vpow2.f32 %v372_v38  ;;  %439 = vadd.xlane.f32.xlu0 %v438_v54  ;;  %v432_v6 = vadd.f32 %v889_v61, %v887_v50 }
  0xb4   : > { %896 = vpow2.f32 %v374_v45  ;;  %v1371_v0 = vpop.xlane.xlu2 %313  ;;  %v1373_v1 = vpop.xlane.xlu1 %310 }
  0xb5   : > { %1620 = vst [vmem:[#allocation6_spill] sm:$0xff] %v1373_v1  ;;  %898 = vpow2.f32 %v380_v47  ;;  %v352_v2 = vsub.f32 %v1216_v39, %v1371_v0  ;;  %v353_v5 = vsub.f32 %v1219_v40, %v1371_v0  ;;  %v1379_v21 = vpop.xlane.xlu0 %307  ;;  %433 = vadd.xlane.f32.xlu1 %v432_v6  ;;  %v350_v34 = vsub.f32 %v1222_v41, %v1373_v1 }
  0xb6   : > { %900 = vpow2.f32 %v382_v49  ;;  %v348_v22 = vsub.f32 %v1228_v43, %v1379_v21  ;;  %v349_v30 = vsub.f32 %v1231_v44, %v1379_v21  ;;  %v351_v38 = vsub.f32 %v1225_v42, %v1373_v1 }
  0xb7   : > { %v891_v33 = vpop.eup %890  ;;  %902 = vpow2.f32 %v384_v51  ;;  %v400_v3 = vmul.f32 1.442695, %v352_v2  ;;  %v402_v4 = vmul.f32 1.442695, %v353_v5  ;;  %v396_v50 = vmul.f32 1.442695, %v350_v34 }
  0xb8   : > { %v893_v35 = vpop.eup %892  ;;  %904 = vpow2.f32 %v386_v63  ;;  %v392_v36 = vmul.f32 1.442695, %v348_v22  ;;  %v394_v37 = vmul.f32 1.442695, %v349_v30  ;;  %v398_v61 = vmul.f32 1.442695, %v351_v38 }
  0xb9   : > { %v895_v45 = vpop.eup %894  ;;  %906 = vpow2.f32 %v400_v3  ;;  %v447_v46 = vadd.f32 %v893_v35, %v891_v33 }
  0xba   : > { %v897_v47 = vpop.eup %896  ;;  %908 = vpow2.f32 %v402_v4 }
  0xbb   : > { %v899_v48 = vpop.eup %898  ;;  %910 = vpow2.f32 %v392_v36  ;;  %v435_v49 = vadd.f32 %v897_v47, %v895_v45  ;;  %448 = vadd.xlane.f32.xlu0 %v447_v46 }
  0xbc   : > { %v901_v51 = vpop.eup %900  ;;  %912 = vpow2.f32 %v394_v37  ;;  %v1389_v54 = vpop.xlane.xlu2 %322 }
  0xbd   : > { %1621 = vst [vmem:[#allocation7_spill] sm:$0xff] %v1389_v54  ;;  %v1391_v63 = vpop.xlane.xlu1 %319  ;;  %v903_v2 = vpop.eup %902  ;;  %436 = vadd.xlane.f32.xlu2 %v435_v49  ;;  %v358_v5 = vsub.f32 %v1246_v55, %v1389_v54  ;;  %v359_v6 = vsub.f32 %v1249_v56, %v1389_v54  ;;  %v441_v22 = vadd.f32 %v901_v51, %v899_v48  ;;  %914 = vpow2.f32 %v396_v50 }
  0xbe   : > { %1622 = vst [vmem:[#allocation8_spill] sm:$0xff] %v1391_v63  ;;  %v1397_v30 = vpop.xlane.xlu0 %316  ;;  %v905_v33 = vpop.eup %904  ;;  %v356_v37 = vsub.f32 %v1252_v57, %v1391_v63  ;;  %916 = vpow2.f32 %v398_v61  ;;  %v357_v47 = vsub.f32 %v1255_v58, %v1391_v63 }
  0xbf   : > { %v354_v3 = vsub.f32 %v1258_v59, %v1397_v30  ;;  %v355_v4 = vsub.f32 %v1261_v60, %v1397_v30  ;;  %v907_v34 = vpop.eup %906  ;;  %v412_v35 = vmul.f32 1.442695, %v358_v5  ;;  %v414_v36 = vmul.f32 1.442695, %v359_v6  ;;  %442 = vadd.xlane.f32.xlu1 %v441_v22 }
  0xc0   : > { %v909_v38 = vpop.eup %908  ;;  %v444_v5 = vadd.f32 %v905_v33, %v903_v2  ;;  %v408_v6 = vmul.f32 1.442695, %v356_v37  ;;  %v410_v1 = vmul.f32 1.442695, %v357_v47 }
  0xc1   : > { %v404_v45 = vmul.f32 1.442695, %v354_v3  ;;  %v406_v46 = vmul.f32 1.442695, %v355_v4  ;;  %v911_v48 = vpop.eup %910  ;;  %918 = vpow2.f32 %v412_v35  ;;  %v456_v49 = vadd.f32 %v909_v38, %v907_v34 }
  0xc2   : > { %v913_v51 = vpop.eup %912  ;;  %920 = vpow2.f32 %v414_v36 }
  0xc3   : > { %922 = vpow2.f32 %v404_v45  ;;  %v450_v50 = vadd.f32 %v913_v51, %v911_v48  ;;  %v915_v61 = vpop.eup %914  ;;  %457 = vadd.xlane.f32.xlu0 %v456_v49 }
  0xc4   : > { %924 = vpow2.f32 %v406_v46  ;;  %v1407_v22 = vpop.xlane.xlu2 %331  ;;  %v917_v2 = vpop.eup %916 }
  0xc5   : > { %1623 = vst [vmem:[#allocation9_spill] sm:$0xff] %v1407_v22  ;;  %v1409_v54 = vpop.xlane.xlu1 %328  ;;  %445 = vadd.xlane.f32.xlu2 %v444_v5  ;;  %v364_v3 = vsub.f32 %v1276_v8, %v1407_v22  ;;  %v365_v4 = vsub.f32 %v1279_v13, %v1407_v22  ;;  %926 = vpow2.f32 %v408_v6  ;;  %v453_v22 = vadd.f32 %v917_v2, %v915_v61 }
  0xc6   : > { %v1415_v34 = vpop.xlane.xlu0 %325  ;;  %v362_v45 = vsub.f32 %v1282_v16, %v1409_v54  ;;  %928 = vpow2.f32 %v410_v1  ;;  %v363_v49 = vsub.f32 %v1285_v17, %v1409_v54 }
  0xc7   : > { %v360_v33 = vsub.f32 %v1288_v18, %v1415_v34  ;;  %v361_v35 = vsub.f32 %v1291_v19, %v1415_v34  ;;  %v919_v36 = vpop.eup %918  ;;  %v424_v37 = vmul.f32 1.442695, %v364_v3  ;;  %v426_v38 = vmul.f32 1.442695, %v365_v4  ;;  %451 = vadd.xlane.f32.xlu1 %v450_v50 }
  0xc8   : > { %v921_v46 = vpop.eup %920  ;;  %v420_v3 = vmul.f32 1.442695, %v362_v45  ;;  %v422_v4 = vmul.f32 1.442695, %v363_v49 }
  0xc9   : > { %v416_v47 = vmul.f32 1.442695, %v360_v33  ;;  %v418_v48 = vmul.f32 1.442695, %v361_v35  ;;  %v923_v51 = vpop.eup %922  ;;  %930 = vpow2.f32 %v424_v37  ;;  %v465_v5 = vadd.f32 %v921_v46, %v919_v36 }
  0xca   : > { %v925_v63 = vpop.eup %924  ;;  %932 = vpow2.f32 %v426_v38 }
  0xcb   : > { %934 = vpow2.f32 %v416_v47  ;;  %v459_v6 = vadd.f32 %v925_v63, %v923_v51  ;;  %v927_v52 = vpop.eup %926  ;;  %466 = vadd.xlane.f32.xlu0 %v465_v5  ;;  %v528_v47 = vlaneseq }
  0xcc   : > { %936 = vpow2.f32 %v418_v48  ;;  %v549_v50 = vpop.permute.xlu2 %548  ;;  %v929_v33 = vpop.eup %928 }
  0xcd   : > { %454 = vadd.xlane.f32.xlu2 %v453_v22  ;;  %938 = vpow2.f32 %v420_v3  ;;  %v462_v46 = vadd.f32 %v929_v33, %v927_v52  ;;  %v1431_v3 = vand.u32 127, %v528_v47 }
  0xce   : > { %v1425_v1 = vpop.xlane.xlu0 %334  ;;  %940 = vpow2.f32 %v422_v4 }
  0xcf   : > { %v366_v35 = vsub.f32 %v1302_v31, %v1425_v1  ;;  %v367_v61 = vsub.f32 %v1305_v32, %v1425_v1  ;;  %v931_v2 = vpop.eup %930  ;;  %460 = vadd.xlane.f32.xlu1 %v459_v6  ;;  %vm595_vm0 = vcmp.eq.s32.totalorder %v1431_v3, %v549_v50 }
  0xd0   : > { %v933_v36 = vpop.eup %932 }
  0xd1   : > { %v428_v63 = vmul.f32 1.442695, %v366_v35  ;;  %v430_v37 = vmul.f32 1.442695, %v367_v61  ;;  %v935_v38 = vpop.eup %934  ;;  %v474_v45 = vadd.f32 %v933_v36, %v931_v2  ;;  %v1434_v61 = vadd.s32 128, %v1431_v3 }
  0xd2   : > { %v937_v22 = vpop.eup %936  ;;  %v627_v2 = vsel %vm595_vm0, %v1169_v14, 0.0 }
  0xd3   : > { %942 = vpow2.f32 %v428_v63  ;;  %v468_v48 = vadd.f32 %v937_v22, %v935_v38  ;;  %v939_v51 = vpop.eup %938  ;;  %475 = vadd.xlane.f32.xlu0 %v474_v45  ;;  %vm596_vm1 = vcmp.eq.s32.totalorder %v1434_v61, %v549_v50 }
  0xd4   : > { %944 = vpow2.f32 %v430_v37  ;;  %v558_v49 = vpop.permute.xlu2 %557  ;;  %v941_v5 = vpop.eup %940  ;;  %v628_v36 = vsel %vm596_vm1, %v1172_v15, 0.0  ;;  %v545_v37 = vld [vmem:[%s1319_s5 + $0x70] sm:$0xff]  ;;  %v546_v15 = vld [vmem:[%s1319_s5 + $0x78] sm:$0xff] }
  0xd5   : > { %463 = vadd.xlane.f32.xlu2 %v462_v46  ;;  %v471_v35 = vadd.f32 %v941_v5, %v939_v51  ;;  %v659_v63 = vadd.f32 %v628_v36, %v627_v2  ;;  %vm601_vm2 = vcmp.eq.s32.totalorder %v1431_v3, %v558_v49  ;;  %vm602_vm3 = vcmp.eq.s32.totalorder %v1434_v61, %v558_v49 }
  0xd6   : > { %v633_v45 = vsel %vm601_vm2, %v1192_v26, 0.0  ;;  %v634_v46 = vsel %vm602_vm3, %v1195_v27, 0.0 }
  0xd7   : > { %469 = vadd.xlane.f32.xlu1 %v468_v48  ;;  %v668_v50 = vadd.f32 %v634_v46, %v633_v45 }
  0xd9   : > { %v943_v6 = vpop.eup %942 }
  0xda   : > { %v945_v4 = vpop.eup %944 }
  0xdb   : > { %v477_v52 = vadd.f32 %v945_v4, %v943_v6 }
  0xdc   : > { %v1436_v33 = vpop.permute.xlu2 %560  ;;  %v555_v26 = vpop.permute.xlu1 %554 }
  0xdd   : > { %472 = vadd.xlane.f32.xlu2 %v471_v35  ;;  %vm599_vm14 = vcmp.eq.s32.totalorder %v1431_v3, %v555_v26  ;;  %vm600_vm15 = vcmp.eq.s32.totalorder %v1434_v61, %v555_v26  ;;  %vm603_vm2 = vcmp.eq.s32.totalorder %v1431_v3, %v1436_v33  ;;  %vm604_vm3 = vcmp.eq.s32.totalorder %v1434_v61, %v1436_v33 }
  0xde   : > { %v635_v46 = vsel %vm603_vm2, %v1156_v9, 0.0 }
  0xdf   : > { %478 = vadd.xlane.f32.xlu1 %v477_v52 }
  0xe0   : > { %v552_v35 = vpop.permute.xlu0 %551 }
  0xe1   : > { %vm597_vm10 = vcmp.eq.s32.totalorder %v1431_v3, %v552_v35  ;;  %vm598_vm11 = vcmp.eq.s32.totalorder %v1434_v61, %v552_v35 }
  0xe2   : > { %v630_v52 = vsel %vm598_vm11, %v1201_v29, 0.0  ;;  %v632_v29 = vsel %vm600_vm15, %v1165_v12, 0.0 }
  0xe4   : > { %v567_v38 = vpop.permute.xlu2 %566  ;;  %v564_v6 = vpop.permute.xlu1 %563 }
  0xe5   : > { %vm607_vm4 = vcmp.eq.s32.totalorder %v1431_v3, %v567_v38  ;;  %vm608_vm5 = vcmp.eq.s32.totalorder %v1434_v61, %v567_v38  ;;  %vm605_vm12 = vcmp.eq.s32.totalorder %v1431_v3, %v564_v6  ;;  %vm606_vm13 = vcmp.eq.s32.totalorder %v1434_v61, %v564_v6 }
  0xe6   : > { %v639_v22 = vsel %vm607_vm4, %v1228_v43, 0.0  ;;  %v640_v47 = vsel %vm608_vm5, %v1231_v44, 0.0  ;;  %v638_v2 = vsel %vm606_vm13, %v1189_v25, 0.0 }
  0xe7   : > { %660 = vadd.xlane.f32.xlu1 %v659_v63  ;;  %590 = vperm.xlu0 %880, %v545_v37   ;;  %v677_v48 = vadd.f32 %v640_v47, %v639_v22 }
  0xe8   : > { %v573_v36 = vpop.permute.xlu0 %572 }
  0xe9   : > { %vm611_vm0 = vcmp.eq.s32.totalorder %v1431_v3, %v573_v36  ;;  %vm612_vm1 = vcmp.eq.s32.totalorder %v1434_v61, %v573_v36 }
  0xea   : > { %v644_v25 = vsel %vm612_vm1, %v1219_v40, 0.0 }
  0xec   : > { %v576_v14 = vpop.permute.xlu2 %575 }
  0xed   : > { %vm613_vm6 = vcmp.eq.s32.totalorder %v1431_v3, %v576_v14  ;;  %vm614_vm7 = vcmp.eq.s32.totalorder %v1434_v61, %v576_v14 }
  0xee   : > { %v645_v27 = vsel %vm613_vm6, %v1258_v59, 0.0  ;;  %v646_v49 = vsel %vm614_vm7, %v1261_v60, 0.0  ;;  %v570_v59 = vpop.permute.xlu1 %569  ;;  %v629_v60 = vsel %vm597_vm10, %v1198_v28, 0.0  ;;  %v631_v28 = vsel %vm599_vm14, %v1162_v11, 0.0 }
  0xef   : > { %669 = vadd.xlane.f32.xlu1 %v668_v50  ;;  %v686_v5 = vadd.f32 %v646_v49, %v645_v27  ;;  %v665_v38 = vadd.f32 %v632_v29, %v631_v28  ;;  %v636_v50 = vsel %vm604_vm3, %v1159_v10, 0.0  ;;  %vm609_vm6 = vcmp.eq.s32.totalorder %v1431_v3, %v570_v59 }
  0xf0   : > { %v582_v11 = vpop.permute.xlu0 %581  ;;  %vm610_vm7 = vcmp.eq.s32.totalorder %v1434_v61, %v570_v59  ;;  %v671_v33 = vadd.f32 %v636_v50, %v635_v46  ;;  %v641_v14 = vsel %vm609_vm6, %v1222_v41, 0.0  ;;  %vm723_vm14 = vcmask 7168  }
  0xf1   : > { %vm617_vm4 = vcmp.eq.s32.totalorder %v1431_v3, %v582_v11  ;;  %vm618_vm5 = vcmp.eq.s32.totalorder %v1434_v61, %v582_v11  ;;  %v642_v9 = vsel %vm610_vm7, %v1225_v42, 0.0 }
  0xf2   : > { %v650_v40 = vsel %vm618_vm5, %v1249_v56, 0.0  ;;  %v680_v22 = vadd.f32 %v642_v9, %v641_v14 }
  0xf4   : > { %v585_v51 = vpop.permute.xlu2 %584 }
  0xf5   : > { %593 = vperm.xlu2 %879, %v546_v15   ;;  %vm619_vm8 = vcmp.eq.s32.totalorder %v1431_v3, %v585_v51  ;;  %vm620_vm9 = vcmp.eq.s32.totalorder %v1434_v61, %v585_v51 }
  0xf6   : > { %v651_v43 = vsel %vm619_vm8, %v1288_v18, 0.0  ;;  %v652_v44 = vsel %vm620_vm9, %v1291_v19, 0.0  ;;  %v662_v18 = vadd.f32 %v630_v52, %v629_v60  ;;  %v637_v19 = vsel %vm605_vm12, %v1186_v24, 0.0  ;;  %v579_v63 = vpop.permute.xlu1 %578 }
  0xf7   : > { %678 = vadd.xlane.f32.xlu1 %v677_v48  ;;  %v695_v4 = vadd.f32 %v652_v44, %v651_v43  ;;  %v674_v37 = vadd.f32 %v638_v2, %v637_v19  ;;  %v643_v24 = vsel %vm611_vm0, %v1216_v39, 0.0  ;;  %v649_v39 = vsel %vm617_vm4, %v1246_v55, 0.0 }
  0xf8   : > { %v683_v12 = vadd.f32 %v644_v25, %v643_v24  ;;  %v692_v10 = vadd.f32 %v650_v40, %v649_v39  ;;  %vm615_vm8 = vcmp.eq.s32.totalorder %v1431_v3, %v579_v63  ;;  %vm616_vm9 = vcmp.eq.s32.totalorder %v1434_v61, %v579_v63 }
  0xf9   : > { %v647_v48 = vsel %vm615_vm8, %v1252_v57, 0.0  ;;  %v648_v55 = vsel %vm616_vm9, %v1255_v58, 0.0 }
  0xfa   : > { %v689_v26 = vadd.f32 %v648_v55, %v647_v48 }
  0xfe   : > { %v588_v45 = vpop.permute.xlu1 %587 }
  0xff   : > { %687 = vadd.xlane.f32.xlu1 %v686_v5  ;;  %vm621_vm10 = vcmp.eq.s32.totalorder %v1431_v3, %v588_v45  ;;  %vm622_vm11 = vcmp.eq.s32.totalorder %v1434_v61, %v588_v45 }
 0x100   : > { %v653_v49 = vsel %vm621_vm10, %v1282_v16, 0.0  ;;  %v654_v51 = vsel %vm622_vm11, %v1285_v17, 0.0 }
 0x101   : > { %v698_v5 = vadd.f32 %v654_v51, %v653_v49 }
 0x107   : > { %696 = vadd.xlane.f32.xlu1 %v695_v4 }
 0x111   : > { %663 = vadd.xlane.f32.xlu0 %v662_v18 }
 0x119   : > { %675 = vadd.xlane.f32.xlu0 %v674_v37 }
 0x11e   : > { %666 = vadd.xlane.f32.xlu2 %v665_v38 }
 0x121   : > { %684 = vadd.xlane.f32.xlu0 %v683_v12 }
 0x126   : > { %672 = vadd.xlane.f32.xlu2 %v671_v33  ;;  %v1490_v47 = vpop.xlane.xlu0 %439 }
 0x128   : > { %v434_v15 = vpop.xlane.xlu1 %433 }
 0x129   : > { %693 = vadd.xlane.f32.xlu0 %v692_v10  ;;  %946 = vlog2.f32 %v434_v15 }
 0x12e   : > { %681 = vadd.xlane.f32.xlu2 %v680_v22  ;;  %v1498_v42 = vpop.xlane.xlu0 %448 }
 0x12f   : > { %v947_v16 = vpop.eup %946 }
 0x130   : > { %v1496_v56 = vpop.xlane.xlu2 %436  ;;  %v481_v52 = vmul.f32 0.6931472, %v947_v16 }
 0x132   : > { %v443_v41 = vpop.xlane.xlu1 %442  ;;  %v512_v19 = vadd.f32 %v481_v52, %v1343_v62 }
 0x133   : > { %948 = vlog2.f32 %v443_v41 }
 0x136   : > { %690 = vadd.xlane.f32.xlu2 %v689_v26  ;;  %v1506_v58 = vpop.xlane.xlu0 %457 }
 0x138   : > { %v1502_v27 = vpop.xlane.xlu2 %445 }
 0x139   : > { %v949_v2 = vpop.eup %948 }
 0x13a   : > { %v452_v57 = vpop.xlane.xlu1 %451  ;;  %v487_v62 = vmul.f32 0.6931472, %v949_v2 }
 0x13b   : > { %950 = vlog2.f32 %v452_v57 }
 0x13e   : > { %699 = vadd.xlane.f32.xlu2 %v698_v5  ;;  %v1512_v4 = vpop.xlane.xlu0 %466 }
 0x140   : > { %v1508_v43 = vpop.xlane.xlu2 %454 }
 0x141   : > { %v951_v11 = vpop.eup %950 }
 0x142   : > { %v461_v44 = vpop.xlane.xlu1 %460 }
 0x143   : > { %952 = vlog2.f32 %v461_v44 }
 0x146   : > { %v1518_v17 = vpop.xlane.xlu0 %475 }
 0x148   : > { %v1510_v6 = vpop.xlane.xlu2 %463 }
 0x149   : > { %v953_v46 = vpop.eup %952 }
 0x14a   : > { %v470_v35 = vpop.xlane.xlu1 %469 }
 0x14b   : > { %954 = vlog2.f32 %v470_v35 }
 0x14c   : > { %956 = vlog2.f32 %v1496_v56 }
 0x14d   : > { %958 = vlog2.f32 %v1498_v42 }
 0x14e   : > { %960 = vlog2.f32 %v1490_v47 }
 0x14f   : > { %962 = vlog2.f32 %v1506_v58 }
 0x150   : > { %v1514_v59 = vpop.xlane.xlu2 %472  ;;  %964 = vlog2.f32 %v1502_v27 }
 0x151   : > { %v955_v33 = vpop.eup %954  ;;  %966 = vlog2.f32 %v1512_v4 }
 0x152   : > { %v1516_v60 = vpop.xlane.xlu1 %478  ;;  %v505_v14 = vmul.f32 0.6931472, %v955_v33  ;;  %v957_v15 = vpop.eup %956  ;;  %968 = vlog2.f32 %v1508_v43 }
 0x153   : > { %v483_v22 = vmul.f32 0.6931472, %v957_v15  ;;  %v959_v48 = vpop.eup %958  ;;  %970 = vlog2.f32 %v1510_v6  ;;  %v1627_v6 = vld [vmem:[#allocation8_spill] sm:$0xff] }
 0x154   : > { %v961_v56 = vpop.eup %960  ;;  %972 = vlog2.f32 %v1514_v59 }
 0x155   : > { %v485_v26 = vmul.f32 0.6931472, %v961_v56  ;;  %v963_v49 = vpop.eup %962  ;;  %974 = vlog2.f32 %v1516_v60 }
 0x156   : > { %v965_v57 = vpop.eup %964  ;;  %v497_v5 = vmul.f32 0.6931472, %v963_v49  ;;  %976 = vlog2.f32 %v1518_v17 }
 0x157   : > { %v489_v27 = vmul.f32 0.6931472, %v965_v57  ;;  %v967_v35 = vpop.eup %966 }
 0x158   : > { %v594_v18 = vpop.permute.xlu2 %593 }
 0x159   : > { %vm625_vm12 = vcmp.eq.s32.totalorder %v1431_v3, %v594_v18  ;;  %vm626_vm13 = vcmp.eq.s32.totalorder %v1434_v61, %v594_v18  ;;  %v591_v29 = vpop.permute.xlu0 %590  ;;  %v969_v18 = vpop.eup %968 }
 0x15a   : > { %v661_v36 = vpop.xlane.xlu1 %660  ;;  %v657_v63 = vsel %vm625_vm12, %v1302_v31, 0.0  ;;  %v658_v37 = vsel %vm626_vm13, %v1305_v32, 0.0  ;;  %vm623_vm15 = vcmp.eq.s32.totalorder %v1431_v3, %v591_v29  ;;  %vm624_vm0 = vcmp.eq.s32.totalorder %v1434_v61, %v591_v29  ;;  %v1626_v29 = vld [vmem:[#allocation6_spill] sm:$0xff] }
 0x15b   : > { %v707_v28 = vsub.f32 %v512_v19, %v661_v36  ;;  %v704_v38 = vadd.f32 %v658_v37, %v657_v63  ;;  %v655_v24 = vsel %vm623_vm15, %v1276_v8, 0.0  ;;  %v656_v25 = vsel %vm624_vm0, %v1279_v13, 0.0  ;;  %v1625_v63 = vld [vmem:[#allocation7_spill] sm:$0xff] }
 0x15c   : > { %v701_v31 = vadd.f32 %v656_v25, %v655_v24  ;;  %v515_v32 = vadd.f32 %v487_v62, %v1351_v20  ;;  %v493_v3 = vmul.f32 0.6931472, %v951_v11  ;;  %v499_v13 = vmul.f32 0.6931472, %v953_v46  ;;  %v971_v62 = vpop.eup %970 }
 0x15d   : > { %724 = vst.msk [vmem:[%s1528_s6] sm:$0xff] %vm723_vm14, %v707_v28  ;;  %705 = vadd.xlane.f32.xlu1 %v704_v38  ;;  %v503_v19 = vmul.f32 0.6931472, %v967_v35  ;;  %v495_v43 = vmul.f32 0.6931472, %v969_v18  ;;  %v973_v11 = vpop.eup %972 }
 0x15e   : > { %702 = vadd.xlane.f32.xlu0 %v701_v31  ;;  %v518_v61 = vadd.f32 %v493_v3, %v1379_v21  ;;  %v521_v20 = vadd.f32 %v499_v13, %v1397_v30  ;;  %v524_v21 = vadd.f32 %v505_v14, %v1415_v34  ;;  %v513_v30 = vadd.f32 %v483_v22, %v1357_v23  ;;  %v975_v59 = vpop.eup %974  ;;  %v1628_v14 = vld [vmem:[#allocation9_spill] sm:$0xff] }
 0x15f   : > { %v491_v34 = vmul.f32 0.6931472, %v959_v48  ;;  %v514_v23 = vadd.f32 %v485_v26, %v1337_v53  ;;  %v1624_v53 = vld [vmem:[#allocation5_spill] sm:$0xff]  ;;  %v519_v38 = vadd.f32 %v495_v43, %v1626_v29  ;;  %v501_v31 = vmul.f32 0.6931472, %v971_v62 }
 0x160   : > { %v516_v52 = vadd.f32 %v489_v27, %v1624_v53  ;;  %v507_v3 = vmul.f32 0.6931472, %v973_v11  ;;  %v511_v13 = vmul.f32 0.6931472, %v975_v59 }
 0x161   : > { %v517_v42 = vadd.f32 %v491_v34, %v1349_v7  ;;  %v520_v7 = vadd.f32 %v497_v5, %v1371_v0  ;;  %v523_v0 = vadd.f32 %v503_v19, %v1625_v63 }
 0x162   : > { %v670_v45 = vpop.xlane.xlu1 %669  ;;  %v527_v33 = vadd.f32 %v511_v13, %v1425_v1 }
 0x163   : > { %v710_v12 = vsub.f32 %v515_v32, %v670_v45  ;;  %v522_v32 = vadd.f32 %v501_v31, %v1627_v6 }
 0x165   : > { %727 = vst.msk [vmem:[%s1528_s6 + $0x18] sm:$0xff] %vm723_vm14, %v710_v12 }
 0x16a   : > { %v679_v8 = vpop.xlane.xlu1 %678 }
 0x16b   : > { %v713_v50 = vsub.f32 %v518_v61, %v679_v8  ;;  %v525_v61 = vadd.f32 %v507_v3, %v1409_v54 }
 0x16d   : > { %730 = vst.msk [vmem:[%s1528_s6 + $0x30] sm:$0xff] %vm723_vm14, %v713_v50  ;;  %v977_v50 = vpop.eup %976 }
 0x172   : > { %v688_v39 = vpop.xlane.xlu1 %687 }
 0x173   : > { %v716_v40 = vsub.f32 %v521_v20, %v688_v39  ;;  %v509_v20 = vmul.f32 0.6931472, %v977_v50 }
 0x175   : > { %733 = vst.msk [vmem:[%s1528_s6 + $0x48] sm:$0xff] %vm723_vm14, %v716_v40 }
 0x17a   : > { %v697_v9 = vpop.xlane.xlu1 %696 }
 0x17b   : > { %v719_v10 = vsub.f32 %v524_v21, %v697_v9  ;;  %v526_v21 = vadd.f32 %v509_v20, %v1628_v14 }
 0x17d   : > { %736 = vst.msk [vmem:[%s1528_s6 + $0x60] sm:$0xff] %vm723_vm14, %v719_v10 }
 0x184   : > { %v664_v55 = vpop.xlane.xlu0 %663 }
 0x185   : > { %v708_v41 = vsub.f32 %v513_v30, %v664_v55 }
 0x187   : > { %725 = vst.msk [vmem:[%s1528_s6 + $0x8] sm:$0xff] %vm723_vm14, %v708_v41 }
 0x18c   : > { %v676_v47 = vpop.xlane.xlu0 %675 }
 0x18d   : > { %v712_v51 = vsub.f32 %v517_v42, %v676_v47 }
 0x18f   : > { %729 = vst.msk [vmem:[%s1528_s6 + $0x28] sm:$0xff] %vm723_vm14, %v712_v51 }
 0x191   : > { %v667_v58 = vpop.xlane.xlu2 %666 }
 0x192   : > { %v709_v44 = vsub.f32 %v514_v23, %v667_v58 }
 0x194   : > { %726 = vst.msk [vmem:[%s1528_s6 + $0x10] sm:$0xff] %vm723_vm14, %v709_v44  ;;  %v685_v16 = vpop.xlane.xlu0 %684 }
 0x195   : > { %v715_v4 = vsub.f32 %v520_v7, %v685_v16 }
 0x197   : > { %732 = vst.msk [vmem:[%s1528_s6 + $0x40] sm:$0xff] %vm723_vm14, %v715_v4 }
 0x199   : > { %v673_v2 = vpop.xlane.xlu2 %672 }
 0x19a   : > { %v711_v36 = vsub.f32 %v516_v52, %v673_v2 }
 0x19c   : > { %728 = vst.msk [vmem:[%s1528_s6 + $0x20] sm:$0xff] %vm723_vm14, %v711_v36  ;;  %v694_v37 = vpop.xlane.xlu0 %693 }
 0x19d   : > { %v718_v28 = vsub.f32 %v523_v0, %v694_v37 }
 0x19f   : > { %735 = vst.msk [vmem:[%s1528_s6 + $0x58] sm:$0xff] %vm723_vm14, %v718_v28 }
 0x1a1   : > { %v682_v24 = vpop.xlane.xlu2 %681 }
 0x1a2   : > { %v714_v25 = vsub.f32 %v519_v38, %v682_v24 }
 0x1a4   : > { %731 = vst.msk [vmem:[%s1528_s6 + $0x38] sm:$0xff] %vm723_vm14, %v714_v25 }
 0x1a9   : > { %v691_v45 = vpop.xlane.xlu2 %690 }
 0x1aa   : > { %v717_v12 = vsub.f32 %v522_v32, %v691_v45 }
 0x1ac   : > { %734 = vst.msk [vmem:[%s1528_s6 + $0x50] sm:$0xff] %vm723_vm14, %v717_v12 }
 0x1b1   : > { %v700_v46 = vpop.xlane.xlu2 %699 }
 0x1b2   : > { %v720_v8 = vsub.f32 %v525_v61, %v700_v46 }
 0x1b4   : > { %737 = vst.msk [vmem:[%s1528_s6 + $0x68] sm:$0xff] %vm723_vm14, %v720_v8 }
 0x1d0   : > { %v706_v39 = vpop.xlane.xlu1 %705 }
 0x1d1   : > { %v722_v40 = vsub.f32 %v527_v33, %v706_v39  ;;  %v703_v54 = vpop.xlane.xlu0 %702 }
 0x1d2   : > { %v721_v9 = vsub.f32 %v526_v21, %v703_v54 }
 0x1d3   : > { %739 = vst.msk [vmem:[%s1528_s6 + $0x78] sm:$0xff] %vm723_vm14, %v722_v40 }
 0x1d4   : > { %738 = vst.msk [vmem:[%s1528_s6 + $0x70] sm:$0xff] %vm723_vm14, %v721_v9 }
 0x1d5 PF: > { %p13_p7 = scmp.ge.s32.totalorder %s1087_s17, 6   ;;  %s1629_s12 = smov %s1034_s13 }
 0x1d6   : > { %s1630_s13 = smov %s1038_s14  ;;  %s1631_s14 = smov %s1097_s20 }
 0x1d7   : > { %s1632_s15 = smov %s1087_s17  ;;  %15 = sbr.rel (!%p13_p7) target bundleno = 3 (0x3), region = 75 }
 0x1dc   :  { %762 = vsyncpa [#allocation3], 1 }
 0x1dd   :  { %764 = vsyncpa [#allocation3 + $0x1], 1 }

</bundles_post_ra>
